<compile_context>
chip_gen: v7x
topology: tpu7x:2x2x1
jax: 0.10.0
libtpu: 0.0.40
codegen_flags: <defaults>
</compile_context>

<pallas_src>
import jax
import jax.numpy as jnp
from jax.experimental import pallas as pl
from jax.experimental.pallas import tpu as pltpu

BN_EPS = 1e-5


def mlp_kernel(x_ref, w1_ref, b1_ref, gamma_ref, beta_ref, w2_ref, b2_ref,
               o_ref, acc_ref):
    k = pl.program_id(1)

    @pl.when(k == 0)
    def _():
        acc_ref[...] = jnp.zeros_like(acc_ref)

    # ---- Linear 1 for this hidden slice: [B, in] @ [in, TK] (bf16 -> f32) ----
    h = jnp.dot(x_ref[...], w1_ref[...],
                preferred_element_type=jnp.float32) + b1_ref[...]

    # ---- BatchNorm1d (training mode, biased variance) over the full batch ----
    # Single pass: var = E[h^2] - mean^2; fold gamma*rsqrt into one scale.
    inv_b = 1.0 / h.shape[0]
    s1 = jnp.sum(h, axis=0, keepdims=True)
    s2 = jnp.sum(h * h, axis=0, keepdims=True)
    mean = s1 * inv_b
    var = jnp.maximum(s2 * inv_b - mean * mean, 0.0)
    scale = gamma_ref[...] * jax.lax.rsqrt(var + BN_EPS)
    shift = beta_ref[...] - mean * scale

    # ---- BN affine + ReLU (one FMA + max per element) ----
    h_relu = jnp.maximum(h * scale + shift, 0.0)

    # ---- Linear 2 partial product: [B, TK] @ [TK, TO], accumulate in f32 ----
    acc_ref[...] += jnp.dot(h_relu.astype(jnp.bfloat16), w2_ref[...],
                            preferred_element_type=jnp.float32)

    @pl.when(k == pl.num_programs(1) - 1)
    def _():
        o_ref[...] = (acc_ref[...] + b2_ref[...]).astype(o_ref.dtype)


def _round_up(n, m):
    return ((n + m - 1) // m) * m


def _pad2(a, rows, cols):
    pr, pc = rows - a.shape[0], cols - a.shape[1]
    if pr == 0 and pc == 0:
        return a
    return jnp.pad(a, ((0, pr), (0, pc)))


def mlp_forward(x, w1, b1, gamma, beta, w2, b2):
    """x: [B, in_dim] f32; w1: [in_dim, hidden]; b1/gamma/beta: [1, hidden];
    w2: [hidden, out_dim]; b2: [1, out_dim].  Returns [B, out_dim] f32."""
    B, in_dim = x.shape
    hidden = w1.shape[1]
    out_dim = w2.shape[1]

    # Lane-align feature dims; never pad the batch (BN stats must be exact).
    in_p = _round_up(in_dim, 128)

    # Hidden tile (reduction axis). Bounded so the double-buffered bf16 w1
    # slice [in_p, TK] stays well inside the v7x 64 MiB VMEM budget.
    tk = min(512, _round_up(hidden, 128))
    while in_p * tk * 2 * 2 > 24 * 1024 * 1024 and tk > 128:   # 2x double-buffer
        tk //= 2
    hid_p = _round_up(hidden, tk)

    # Output tile ("parallel" axis -> megacore on v7x when out_dim is large).
    to = min(1024, _round_up(out_dim, 128))
    out_p = _round_up(out_dim, to)

    # Padded / cast operands.  Padded hidden cols: b1=gamma=beta=0 and w2 rows
    # = 0, so they contribute exactly 0 downstream.
    xb = _pad2(x, B, in_p).astype(jnp.bfloat16)
    w1b = _pad2(w1, in_p, hid_p).astype(jnp.bfloat16)
    w2b = _pad2(w2, hid_p, out_p).astype(jnp.bfloat16)
    b1p = _pad2(b1, 1, hid_p).astype(jnp.float32)
    gp = _pad2(gamma, 1, hid_p).astype(jnp.float32)
    bp = _pad2(beta, 1, hid_p).astype(jnp.float32)
    b2p = _pad2(b2, 1, out_p).astype(jnp.float32)

    n_out = out_p // to
    n_hid = hid_p // tk

    grid_spec = pltpu.PrefetchScalarGridSpec(
        num_scalar_prefetch=0,
        grid=(n_out, n_hid),
        in_specs=[
            pl.BlockSpec((B, in_p), lambda j, k: (0, 0)),      # x (resident)
            pl.BlockSpec((in_p, tk), lambda j, k: (0, k)),     # w1 slice
            pl.BlockSpec((1, tk), lambda j, k: (0, k)),        # b1 slice
            pl.BlockSpec((1, tk), lambda j, k: (0, k)),        # gamma slice
            pl.BlockSpec((1, tk), lambda j, k: (0, k)),        # beta slice
            pl.BlockSpec((tk, to), lambda j, k: (k, j)),       # w2 slice
            pl.BlockSpec((1, to), lambda j, k: (0, j)),        # b2 slice
        ],
        out_specs=pl.BlockSpec((B, to), lambda j, k: (0, j)),  # resident over k
        scratch_shapes=[pltpu.VMEM((B, to), jnp.float32)],
    )

    out_padded = pl.pallas_call(
        mlp_kernel,
        out_shape=jax.ShapeDtypeStruct((B, out_p), jnp.float32),
        grid_spec=grid_spec,
        compiler_params=pltpu.CompilerParams(
            dimension_semantics=("parallel", "arbitrary"),
            vmem_limit_bytes=48 * 1024 * 1024,
        ),
    )(xb, w1b, b1p, gp, bp, w2b, b2p)

    return out_padded[:, :out_dim]


def init_params(key, in_dim, hidden_dim, out_dim):
    """PyTorch-like nn.Linear init (uniform +-1/sqrt(fan_in)); BN gamma=1, beta=0.
    Weights stored pre-transposed: [in, hidden] and [hidden, out]."""
    k1, k2, k3, k4 = jax.random.split(key, 4)
    bound1 = 1.0 / (in_dim ** 0.5)
    bound2 = 1.0 / (hidden_dim ** 0.5)
    w1 = jax.random.uniform(k1, (in_dim, hidden_dim), jnp.float32, -bound1, bound1)
    b1 = jax.random.uniform(k2, (1, hidden_dim), jnp.float32, -bound1, bound1)
    w2 = jax.random.uniform(k3, (hidden_dim, out_dim), jnp.float32, -bound2, bound2)
    b2 = jax.random.uniform(k4, (1, out_dim), jnp.float32, -bound2, bound2)
    gamma = jnp.ones((1, hidden_dim), jnp.float32)
    beta = jnp.zeros((1, hidden_dim), jnp.float32)
    return w1, b1, gamma, beta, w2, b2


if __name__ == "__main__":
    B, in_dim, hidden_dim, out_dim = 8, 16, 32, 8

    key = jax.random.PRNGKey(0)
    kx, kp = jax.random.split(key)
    x = jax.random.normal(kx, (B, in_dim), jnp.float32)
    params = init_params(kp, in_dim, hidden_dim, out_dim)

    out = mlp_forward(x, *params)
    jax.block_until_ready(out)

    # Pure-JAX reference of the same math (bf16 MXU inputs, f32 accumulation).
    w1, b1, gamma, beta, w2, b2 = params
    xb = x.astype(jnp.bfloat16).astype(jnp.float32)
    w1b = w1.astype(jnp.bfloat16).astype(jnp.float32)
    w2b = w2.astype(jnp.bfloat16).astype(jnp.float32)
    h = xb @ w1b + b1
    mean = h.mean(axis=0, keepdims=True)
    var = ((h - mean) ** 2).mean(axis=0, keepdims=True)
    h = (h - mean) / jnp.sqrt(var + BN_EPS) * gamma + beta
    h = jnp.maximum(h, 0.0).astype(jnp.bfloat16).astype(jnp.float32)
    ref = h @ w2b + b2

    assert out.shape == (B, out_dim)
    assert jnp.allclose(out, ref, atol=2e-2, rtol=2e-2), "mismatch vs reference"

    print("KERNEL_OK")
</pallas_src>

<mosaic_0001>
module attributes {stable_mosaic.version = 11 : i64} {
  func.func @mlp_kernel(%arg0: i32, %arg1: i32, %arg2: memref<8x128xbf16, #tpu.memory_space<vmem>>, %arg3: memref<128x128xbf16, #tpu.memory_space<vmem>>, %arg4: memref<1x128xf32, #tpu.memory_space<vmem>>, %arg5: memref<1x128xf32, #tpu.memory_space<vmem>>, %arg6: memref<1x128xf32, #tpu.memory_space<vmem>>, %arg7: memref<128x128xbf16, #tpu.memory_space<vmem>>, %arg8: memref<1x128xf32, #tpu.memory_space<vmem>>, %arg9: memref<8x128xf32, #tpu.memory_space<vmem>>, %arg10: memref<8x128xf32, #tpu.memory_space<vmem>>) attributes {dimension_semantics = [#tpu.dimension_semantics<parallel>, #tpu.dimension_semantics<arbitrary>], iteration_bounds = array<i64: 1, 1>, scalar_prefetch = 0 : i64, scratch_operands = 1 : i64, tpu.core_type = #tpu.core_type<tc>, window_params = [{pipeline_mode = #tpu.pipeline_mode<synchronous>, transform_indices = @transform_0, window_bounds = array<i64: 8, 128>}, {transform_indices = @transform_1, window_bounds = array<i64: 128, 128>}, {transform_indices = @transform_2, window_bounds = array<i64: 1, 128>}, {transform_indices = @transform_3, window_bounds = array<i64: 1, 128>}, {transform_indices = @transform_4, window_bounds = array<i64: 1, 128>}, {transform_indices = @transform_5, window_bounds = array<i64: 128, 128>}, {transform_indices = @transform_6, window_bounds = array<i64: 1, 128>}, {transform_indices = @transform_7, window_bounds = array<i64: 8, 128>}]} {
    %c0_i32 = arith.constant 0 : i32
    %0 = arith.cmpi eq, %arg1, %c0_i32 : i32
    %1 = arith.extui %0 : i1 to i32
    %c0_i32_0 = arith.constant 0 : i32
    %2 = arith.cmpi ne, %1, %c0_i32_0 : i32
    scf.if %2 {
      %cst_26 = arith.constant 0.000000e+00 : f32
      %45 = vector.broadcast %cst_26 : f32 to vector<8x128xf32>
      %c0_27 = arith.constant 0 : index
      %c0_28 = arith.constant 0 : index
      %46 = vector.load %arg10[%c0_27, %c0_28] : memref<8x128xf32, #tpu.memory_space<vmem>>, vector<8x128xf32>
      tpu.vector_store %arg10[%c0_27, %c0_28], %45 {strides = array<i32>} : memref<8x128xf32, #tpu.memory_space<vmem>>, vector<8x128xf32>,
    } else {
    }
    %c0 = arith.constant 0 : index
    %c0_1 = arith.constant 0 : index
    %3 = vector.load %arg2[%c0, %c0_1] : memref<8x128xbf16, #tpu.memory_space<vmem>>, vector<8x128xbf16>
    %c0_2 = arith.constant 0 : index
    %c0_3 = arith.constant 0 : index
    %4 = vector.load %arg3[%c0_2, %c0_3] : memref<128x128xbf16, #tpu.memory_space<vmem>>, vector<128x128xbf16>
    %cst = arith.constant dense<0.000000e+00> : vector<8x128xf32>
    %5 = tpu.matmul %3, %4, %cst {dimension_numbers = #tpu.dot_dimension_numbers<[1], [0], [0], [1], [0, 0, 1, 1], [], []>} : vector<8x128xbf16>, vector<128x128xbf16>, vector<8x128xf32> -> vector<8x128xf32>
    %c0_4 = arith.constant 0 : index
    %c0_5 = arith.constant 0 : index
    %6 = vector.load %arg4[%c0_4, %c0_5] : memref<1x128xf32, #tpu.memory_space<vmem>>, vector<1x128xf32>
    %7 = vector.broadcast %6 : vector<1x128xf32> to vector<8x128xf32>
    %8 = arith.addf %5, %7 : vector<8x128xf32>
    %cst_6 = arith.constant dense<0.000000e+00> : vector<128xf32>
    %9 = vector.multi_reduction <add>, %8, %cst_6 [0] : vector<8x128xf32> to vector<128xf32>
    %10 = vector.shape_cast %9 : vector<128xf32> to vector<1x128xf32>
    %11 = arith.mulf %8, %8 : vector<8x128xf32>
    %cst_7 = arith.constant dense<0.000000e+00> : vector<128xf32>
    %12 = vector.multi_reduction <add>, %11, %cst_7 [0] : vector<8x128xf32> to vector<128xf32>
    %13 = vector.shape_cast %12 : vector<128xf32> to vector<1x128xf32>
    %cst_8 = arith.constant 1.250000e-01 : f32
    %14 = vector.broadcast %cst_8 : f32 to vector<1x128xf32>
    %15 = arith.mulf %10, %14 : vector<1x128xf32>
    %cst_9 = arith.constant 1.250000e-01 : f32
    %16 = vector.broadcast %cst_9 : f32 to vector<1x128xf32>
    %17 = arith.mulf %13, %16 : vector<1x128xf32>
    %18 = arith.mulf %15, %15 : vector<1x128xf32>
    %19 = arith.subf %17, %18 : vector<1x128xf32>
    %cst_10 = arith.constant 0.000000e+00 : f32
    %20 = vector.broadcast %cst_10 : f32 to vector<1x128xf32>
    %21 = arith.maximumf %19, %20 : vector<1x128xf32>
    %c0_11 = arith.constant 0 : index
    %c0_12 = arith.constant 0 : index
    %22 = vector.load %arg5[%c0_11, %c0_12] : memref<1x128xf32, #tpu.memory_space<vmem>>, vector<1x128xf32>
    %cst_13 = arith.constant 9.99999974E-6 : f32
    %23 = vector.broadcast %cst_13 : f32 to vector<1x128xf32>
    %24 = arith.addf %21, %23 : vector<1x128xf32>
    %25 = math.rsqrt %24 : vector<1x128xf32>
    %26 = arith.mulf %22, %25 : vector<1x128xf32>
    %c0_14 = arith.constant 0 : index
    %c0_15 = arith.constant 0 : index
    %27 = vector.load %arg6[%c0_14, %c0_15] : memref<1x128xf32, #tpu.memory_space<vmem>>, vector<1x128xf32>
    %28 = arith.mulf %15, %26 : vector<1x128xf32>
    %29 = arith.subf %27, %28 : vector<1x128xf32>
    %30 = vector.broadcast %26 : vector<1x128xf32> to vector<8x128xf32>
    %31 = arith.mulf %8, %30 : vector<8x128xf32>
    %32 = vector.broadcast %29 : vector<1x128xf32> to vector<8x128xf32>
    %33 = arith.addf %31, %32 : vector<8x128xf32>
    %cst_16 = arith.constant 0.000000e+00 : f32
    %34 = vector.broadcast %cst_16 : f32 to vector<8x128xf32>
    %35 = arith.maximumf %33, %34 : vector<8x128xf32>
    %c0_17 = arith.constant 0 : index
    %c0_18 = arith.constant 0 : index
    %36 = vector.load %arg10[%c0_17, %c0_18] : memref<8x128xf32, #tpu.memory_space<vmem>>, vector<8x128xf32>
    %37 = arith.truncf %35 : vector<8x128xf32> to vector<8x128xbf16>
    %c0_19 = arith.constant 0 : index
    %c0_20 = arith.constant 0 : index
    %38 = vector.load %arg7[%c0_19, %c0_20] : memref<128x128xbf16, #tpu.memory_space<vmem>>, vector<128x128xbf16>
    %cst_21 = arith.constant dense<0.000000e+00> : vector<8x128xf32>
    %39 = tpu.matmul %37, %38, %cst_21 {dimension_numbers = #tpu.dot_dimension_numbers<[1], [0], [0], [1], [0, 0, 1, 1], [], []>} : vector<8x128xbf16>, vector<128x128xbf16>, vector<8x128xf32> -> vector<8x128xf32>
    %40 = arith.addf %36, %39 : vector<8x128xf32>
    %c0_22 = arith.constant 0 : index
    %c0_23 = arith.constant 0 : index
    %41 = vector.load %arg10[%c0_22, %c0_23] : memref<8x128xf32, #tpu.memory_space<vmem>>, vector<8x128xf32>
    tpu.vector_store %arg10[%c0_22, %c0_23], %40 {strides = array<i32>} : memref<8x128xf32, #tpu.memory_space<vmem>>, vector<8x128xf32>,
    %c0_i32_24 = arith.constant 0 : i32
    %42 = arith.cmpi eq, %arg1, %c0_i32_24 : i32
    %43 = arith.extui %42 : i1 to i32
    %c0_i32_25 = arith.constant 0 : i32
    %44 = arith.cmpi ne, %43, %c0_i32_25 : i32
    scf.if %44 {
      %c0_26 = arith.constant 0 : index
      %c0_27 = arith.constant 0 : index
      %45 = vector.load %arg10[%c0_26, %c0_27] : memref<8x128xf32, #tpu.memory_space<vmem>>, vector<8x128xf32>
      %c0_28 = arith.constant 0 : index
      %c0_29 = arith.constant 0 : index
      %46 = vector.load %arg8[%c0_28, %c0_29] : memref<1x128xf32, #tpu.memory_space<vmem>>, vector<1x128xf32>
      %47 = vector.broadcast %46 : vector<1x128xf32> to vector<8x128xf32>
      %48 = arith.addf %45, %47 : vector<8x128xf32>
      %c0_30 = arith.constant 0 : index
      %c0_31 = arith.constant 0 : index
      %49 = vector.load %arg9[%c0_30, %c0_31] : memref<8x128xf32, #tpu.memory_space<vmem>>, vector<8x128xf32>
      tpu.vector_store %arg9[%c0_30, %c0_31], %48 {strides = array<i32>} : memref<8x128xf32, #tpu.memory_space<vmem>>, vector<8x128xf32>,
    } else {
    }
    return
  }
  func.func @transform_0(%arg0: i32, %arg1: i32) -> (i32, i32) {
    %c0_i32 = arith.constant 0 : i32
    %c0_i32_0 = arith.constant 0 : i32
    %c0_i32_1 = arith.constant 0 : i32
    return %c0_i32, %c0_i32_0 : i32, i32
  }
  func.func @transform_1(%arg0: i32, %arg1: i32) -> (i32, i32) {
    %c0_i32 = arith.constant 0 : i32
    %c0_i32_0 = arith.constant 0 : i32
    return %c0_i32, %arg1 : i32, i32
  }
  func.func @transform_2(%arg0: i32, %arg1: i32) -> (i32, i32) {
    %c0_i32 = arith.constant 0 : i32
    %c0_i32_0 = arith.constant 0 : i32
    return %c0_i32, %arg1 : i32, i32
  }
  func.func @transform_3(%arg0: i32, %arg1: i32) -> (i32, i32) {
    %c0_i32 = arith.constant 0 : i32
    %c0_i32_0 = arith.constant 0 : i32
    return %c0_i32, %arg1 : i32, i32
  }
  func.func @transform_4(%arg0: i32, %arg1: i32) -> (i32, i32) {
    %c0_i32 = arith.constant 0 : i32
    %c0_i32_0 = arith.constant 0 : i32
    return %c0_i32, %arg1 : i32, i32
  }
  func.func @transform_5(%arg0: i32, %arg1: i32) -> (i32, i32) {
    %c0_i32 = arith.constant 0 : i32
    return %arg1, %arg0 : i32, i32
  }
  func.func @transform_6(%arg0: i32, %arg1: i32) -> (i32, i32) {
    %c0_i32 = arith.constant 0 : i32
    %c0_i32_0 = arith.constant 0 : i32
    return %c0_i32, %arg0 : i32, i32
  }
  func.func @transform_7(%arg0: i32, %arg1: i32) -> (i32, i32) {
    %c0_i32 = arith.constant 0 : i32
    %c0_i32_0 = arith.constant 0 : i32
    return %c0_i32, %arg0 : i32, i32
  }
}

</mosaic_0001>

<bundles_post_ra>
// kernel: tpu_custom_call.1
= control target key start
LH: loop header
LB: loop body
LE: loop exit
PB: predicated region body
PF: predicated region fallthrough
CT: control target
= control target key end

     0   :  { %12 = vsyncpa [#allocation4], 0  ;;  %s671_s0 = inlined_call_operand.hbm [shape: bf16[8,128], index: 0, kind: input, shape index: {}]   ;;  %s672_s1 = inlined_call_operand.hbm [shape: bf16[128,128], index: 1, kind: input, shape index: {}]   ;;  %s673_s2 = inlined_call_operand.vmem [shape: f32[1,128], index: 2, kind: input, shape index: {}]   ;;  %s674_s3 = inlined_call_operand.vmem [shape: f32[1,128], index: 3, kind: input, shape index: {}]   ;;  %s675_s4 = inlined_call_operand.vmem [shape: f32[1,128], index: 4, kind: input, shape index: {}]   ;;  %s676_s5 = inlined_call_operand.hbm [shape: bf16[128,128], index: 5, kind: input, shape index: {}]   ;;  %s677_s6 = inlined_call_operand.vmem [shape: f32[1,128], index: 6, kind: input, shape index: {}]   ;;  %s678_s7 = inlined_call_operand.hbm [shape: f32[8,128], index: 7, kind: output, shape index: {}]  }
   0x1   :  { %13 = vsyncpa [#allocation7], 0 }
   0x2   :  { %14 = vsyncpa [#allocation5], 0  ;;  %s557_s24 = smov [#allocation6]   ;;  %s463_s28 = scalar_lea.hbm %s672_s1, 1024 }
   0x3   :  { %s30_s25 = sshll.u32 %s557_s24, 4  ;;  %p464_p0 = scmp.ne.s32.totalorder %s672_s1, %s463_s28  ;;  %s31_s25 = int_to_ptr.vmem [resolvable:$true] %s30_s25 }
   0x4   :  { %p467_p1 = scmp.lt.u32.totalorder %s463_s28, %s672_s1 }
   0x6   :  { %p469_p2 = pnand %p467_p1, %p464_p0 }
   0x8   :  { %472 = shalt.err (!%p469_p2)
}
   0x9   :  { %s473_s10 = scalar_lea.vmem %s31_s25, 1024  ;;  %p478_p4 = scmp.lt.s32.totalorder %s31_s25, %s31_s25 }
   0xa   :  { %p474_p3 = scmp.ne.s32.totalorder %s31_s25, %s473_s10  ;;  %p479_p5 = scmp.lt.s32.totalorder %s473_s10, %s473_s10 }
   0xc   :  { %p480_p6 = por %p479_p5, %p478_p4 }
   0xe   :  { %p481_p7 = pnand %p480_p6, %p474_p3 }
  0x10   :  { %484 = shalt.err (!%p481_p7)
}
  0x11   :  { %s558_s11 = smov 64   ;;  %s559_s12 = smov 4  }
  0x12   :  { %36 = dma.hbm_to_vmem [thread:$0]  %s672_s1, 1024, %s31_s25, [#allocation7], %s558_s11, %s558_s11, %s559_s12  }
  0x13   :  { %s560_s15 = smov [#allocation3]   ;;  %s561_s17 = smov [#allocation8]  }
  0x14   :  { %s21_s16 = sshll.u32 %s560_s15, 4  ;;  %s48_s18 = sshll.u32 %s561_s17, 4  ;;  %s22_s16 = int_to_ptr.vmem [resolvable:$true] %s21_s16  ;;  %s49_s18 = int_to_ptr.vmem [resolvable:$true] %s48_s18 }
  0x15   :  { %s485_s21 = scalar_lea.hbm %s671_s0, 64 }
  0x16   :  { %p486_p8 = scmp.ne.s32.totalorder %s671_s0, %s485_s21  ;;  %p489_p9 = scmp.lt.u32.totalorder %s485_s21, %s671_s0 }
  0x18   :  { %p491_p10 = pnand %p489_p9, %p486_p8 }
  0x1a   :  { %494 = shalt.err (!%p491_p10)
}
  0x1b   :  { %s495_s1 = scalar_lea.vmem %s22_s16, 64  ;;  %p500_p12 = scmp.lt.s32.totalorder %s22_s16, %s22_s16 }
  0x1c   :  { %p496_p11 = scmp.ne.s32.totalorder %s22_s16, %s495_s1  ;;  %p501_p13 = scmp.lt.s32.totalorder %s495_s1, %s495_s1 }
  0x1e   :  { %p502_p0 = por %p501_p13, %p500_p12 }
  0x20   :  { %p503_p1 = pnand %p502_p0, %p496_p11 }
  0x22   :  { %506 = shalt.err (!%p503_p1)
}
  0x23   :  { %24 = dma.hbm_to_vmem [thread:$0]  %s671_s0, 64, %s22_s16, [#allocation4]  }
  0x24   :  { %s507_s30 = scalar_lea.hbm %s676_s5, 1024 }
  0x25   :  { %p508_p2 = scmp.ne.s32.totalorder %s676_s5, %s507_s30  ;;  %p511_p3 = scmp.lt.u32.totalorder %s507_s30, %s676_s5 }
  0x27   :  { %p513_p4 = pnand %p511_p3, %p508_p2 }
  0x29   :  { %516 = shalt.err (!%p513_p4)
}
  0x2a   :  { %s517_s14 = scalar_lea.vmem %s49_s18, 1024  ;;  %p522_p6 = scmp.lt.s32.totalorder %s49_s18, %s49_s18 }
  0x2b   :  { %p518_p5 = scmp.ne.s32.totalorder %s49_s18, %s517_s14  ;;  %p523_p7 = scmp.lt.s32.totalorder %s517_s14, %s517_s14 }
  0x2d   :  { %p524_p8 = por %p523_p7, %p522_p6 }
  0x2f   :  { %p525_p9 = pnand %p524_p8, %p518_p5 }
  0x31   :  { %528 = shalt.err (!%p525_p9)
}
  0x32   :  { %54 = dma.hbm_to_vmem [thread:$0]  %s676_s5, 1024, %s49_s18, [#allocation7], %s558_s11, %s558_s11, %s559_s12  }
  0x33   :  { %551 = dma.done.wait [#allocation4], 64  }
  0x34   :  { %552 = vsyncadd [#allocation4], 4294967232 }
  0x35   :  { %553 = dma.done.wait [#allocation7], 2048  }
  0x36   :  { %554 = vsyncadd [#allocation7], 4294965248  ;;  %v562_v0 = vmov 0.0   ;;  %vm563_vm0 = vmmov 0   ;;  %v445_v1 = vld [vmem:[#allocation6] sm:$0xff]   ;;  %v446_v2 = vld [vmem:[#allocation6 + $0x8] sm:$0xff]   ;;  %v210_v43 = vlaneseq }
  0x37   :  { %397 = vmatprep.subr.bf16.mxu0 %v562_v0  ;;  %413 = vmatprep.mubr.msk.bf16.mxu0 %vm563_vm0, %v562_v0  ;;  %v447_v3 = vld [vmem:[#allocation6 + $0x10] sm:$0xff]   ;;  %v448_v4 = vld [vmem:[#allocation6 + $0x18] sm:$0xff]   ;;  %v449_v5 = vld [vmem:[#allocation6 + $0x20] sm:$0xff]  }
  0x38   :  { %417 = vmatprep.subr.bf16.mxu1 %v562_v0  ;;  %433 = vmatprep.mubr.msk.bf16.mxu1 %vm563_vm0, %v562_v0  ;;  %v450_v6 = vld [vmem:[#allocation6 + $0x28] sm:$0xff]   ;;  %v451_v7 = vld [vmem:[#allocation6 + $0x30] sm:$0xff]   ;;  %v452_v8 = vld [vmem:[#allocation6 + $0x38] sm:$0xff]   ;;  %v211_v44 = vshrl.u32 %v210_v43, 7 }
  0x39   :  { %398 = vmatpush3.bf16.msra.mxu0 %v445_v1  ;;  %v72_v9 = vld [vmem:[#allocation3] sm:$0xf]  ;;  %v453_v10 = vld [vmem:[#allocation8] sm:$0xff]   ;;  %v454_v11 = vld [vmem:[#allocation8 + $0x8] sm:$0xff]  }
  0x3a   :  { %399 = vmatprep.subr.bf16.mxu0 %v562_v0  ;;  %418 = vmatpush3.bf16.msra.mxu1 %v453_v10  ;;  %v455_v12 = vld [vmem:[#allocation8 + $0x10] sm:$0xff]   ;;  %v456_v13 = vld [vmem:[#allocation8 + $0x18] sm:$0xff]   ;;  %v457_v14 = vld [vmem:[#allocation8 + $0x20] sm:$0xff]   ;;  %v212_v46 = vsub.s32 0, %v211_v44 }
  0x3b   :  { %419 = vmatprep.subr.bf16.mxu1 %v562_v0  ;;  %v458_v15 = vld [vmem:[#allocation8 + $0x28] sm:$0xff]   ;;  %v459_v16 = vld [vmem:[#allocation8 + $0x30] sm:$0xff]   ;;  %v460_v17 = vld [vmem:[#allocation8 + $0x38] sm:$0xff]  }
  0x3c   :  { %v361_v18 = vld [vmem:[%s673_s2] ss:$0 sm:$0xff] }
  0x3d   :  { %400 = vmatpush3.bf16.msra.mxu0 %v446_v2  ;;  %v202_v45 = vld [vmem:[%s674_s3] sm:$0x1]  ;;  %s564_s3 = smov [#allocation9]  }
  0x3e   :  { %401 = vmatprep.subr.bf16.mxu0 %v562_v0  ;;  %420 = vmatpush3.bf16.msra.mxu1 %v454_v11  ;;  %v206_v49 = vld [vmem:[%s675_s4] sm:$0x1]  ;;  %s351_s20 = sshll.u32 %s564_s3, 4  ;;  %s352_s20 = int_to_ptr.vmem [resolvable:$true] %s351_s20 }
  0x3f   :  { %421 = vmatprep.subr.bf16.mxu1 %v562_v0  ;;  %v378_v58 = vld [vmem:[%s677_s6] ss:$0 sm:$0xff]  ;;  %s529_s4 = scalar_lea.vmem %s352_s20, 128  ;;  %p534_p11 = scmp.lt.s32.totalorder %s352_s20, %s352_s20 }
  0x40   :  { %p530_p10 = scmp.ne.s32.totalorder %s352_s20, %s529_s4  ;;  %p535_p12 = scmp.lt.s32.totalorder %s529_s4, %s529_s4 }
  0x41   :  { %402 = vmatpush3.bf16.msra.mxu0 %v447_v3 }
  0x42   :  { %403 = vmatprep.subr.bf16.mxu0 %v562_v0  ;;  %422 = vmatpush3.bf16.msra.mxu1 %v455_v12  ;;  %p536_p13 = por %p535_p12, %p534_p11 }
  0x43   :  { %423 = vmatprep.subr.bf16.mxu1 %v562_v0 }
  0x44   :  { %p537_p0 = pnand %p536_p13, %p530_p10 }
  0x45   :  { %404 = vmatpush3.bf16.msra.mxu0 %v448_v4 }
  0x46   :  { %405 = vmatprep.subr.bf16.mxu0 %v562_v0  ;;  %424 = vmatpush3.bf16.msra.mxu1 %v456_v13 }
  0x47   :  { %425 = vmatprep.subr.bf16.mxu1 %v562_v0 }
  0x49   :  { %406 = vmatpush3.bf16.msra.mxu0 %v449_v5 }
  0x4a   :  { %407 = vmatprep.subr.bf16.mxu0 %v562_v0  ;;  %426 = vmatpush3.bf16.msra.mxu1 %v457_v14 }
  0x4b   :  { %427 = vmatprep.subr.bf16.mxu1 %v562_v0 }
  0x4d   :  { %408 = vmatpush3.bf16.msra.mxu0 %v450_v6 }
  0x4e   :  { %409 = vmatprep.subr.bf16.mxu0 %v562_v0  ;;  %428 = vmatpush3.bf16.msra.mxu1 %v458_v15 }
  0x4f   :  { %429 = vmatprep.subr.bf16.mxu1 %v562_v0 }
  0x51   :  { %410 = vmatpush3.bf16.msra.mxu0 %v451_v7 }
  0x52   :  { %411 = vmatprep.subr.bf16.mxu0 %v562_v0  ;;  %430 = vmatpush3.bf16.msra.mxu1 %v459_v16 }
  0x53   :  { %431 = vmatprep.subr.bf16.mxu1 %v562_v0 }
  0x55   :  { %412 = vmatpush3.bf16.msra.mxu0 %v452_v8 }
  0x56   :  { %432 = vmatpush3.bf16.msra.mxu1 %v460_v17 }
  0x58   :  { %414 = vmatmul.mubr.bf16.vlgmr.msra.gmra.mrb[0].mxu0 %v72_v9 }
 0x12b   :  { %v178_v19 = vpop.f32.mrb[0].mxu0 }
 0x12c   :  { %v179_v20 = vadd.f32 %v361_v18, %v178_v19  ;;  %v415_v21 = vpop.f32.mrb[1].mxu0 }
 0x12d   :  { %v181_v22 = vpop.f32.mrb[2].mxu0 }
 0x12e   :  { %v184_v23 = vrot.slane %v179_v20, 4  ;;  %v190_v24 = vmul.f32 %v179_v20, %v179_v20  ;;  %v416_v25 = vpop.f32.mrb[3].mxu0 }
 0x130   :  { %v185_v26 = vadd.f32 %v184_v23, %v179_v20  ;;  %v191_v27 = vrot.slane %v190_v24, 4 }
 0x132   :  { %v186_v28 = vrot.slane %v185_v26, 2  ;;  %v192_v29 = vadd.f32 %v191_v27, %v190_v24 }
 0x134   :  { %v187_v30 = vadd.f32 %v186_v28, %v185_v26  ;;  %v193_v31 = vrot.slane %v192_v29, 2 }
 0x136   :  { %v188_v32 = vrot.slane %v187_v30, 1  ;;  %v194_v33 = vadd.f32 %v193_v31, %v192_v29 }
 0x138   :  { %v189_v34 = vadd.f32 %v188_v32, %v187_v30  ;;  %v195_v35 = vrot.slane %v194_v33, 1 }
 0x13a   :  { %v196_v36 = vadd.f32 %v195_v35, %v194_v33  ;;  %v197_v37 = vmul.f32 0.125, %v189_v34 }
 0x13c   :  { %v198_v38 = vmul.f32 0.125, %v196_v36  ;;  %v199_v39 = vmul.f32 %v197_v37, %v197_v37 }
 0x13e   :  { %v200_v40 = vsub.f32 %v198_v38, %v199_v39 }
 0x140   :  { %v201_v41 = vmax.f32 %v200_v40, 0.0 }
 0x142   :  { %v203_v42 = vadd.f32 1e-05, %v201_v41 }
 0x144   :  { %461 = vrsqrt.f32 %v203_v42 }
 0x14e   :  { %v462_v47 = vpop.eup %461 }
 0x14f   :  { %v205_v48 = vmul.f32 %v462_v47, %v202_v45 }
 0x151   :  { %v207_v50 = vmul.f32 %v205_v48, %v197_v37  ;;  %v213_v51 = vrot.slane %v205_v48, %v212_v46 }
 0x153   :  { %v208_v52 = vsub.f32 %v206_v49, %v207_v50  ;;  %v215_v53 = vmul.f32 %v213_v51, %v179_v20 }
 0x155   :  { %v220_v54 = vrot.slane %v208_v52, %v212_v46 }
 0x157   :  { %v222_v55 = vadd.f32 %v220_v54, %v215_v53 }
 0x159   :  { %v223_v56 = vmax.f32 %v222_v55, 0.0 }
 0x15b   :  { %v225_v57 = vpack.c.bf16 %v223_v56, %v223_v56 }
 0x15d   :  { %434 = vmatmul.mubr.bf16.vlgmr.msra.gmra.mrb[0].mxu1 %v225_v57 }
 0x230   :  { %v324_v59 = vpop.f32.mrb[0].mxu1 }
 0x231   :  { %v343_v60 = vadd.f32 %v378_v58, %v324_v59  ;;  %v435_v61 = vpop.f32.mrb[1].mxu1 }
 0x232   :  { %v327_v62 = vpop.f32.mrb[2].mxu1 }
 0x233   :  { %344 = vst [vmem:[#allocation9] sm:$0xff] %v343_v60  ;;  %v436_v63 = vpop.f32.mrb[3].mxu1 }
 0x234   :  { %540 = shalt.err (!%p537_p0)
}
 0x235   :  { %s541_s6 = scalar_lea.hbm %s678_s7, 128 }
 0x236   :  { %p542_p1 = scmp.ne.s32.totalorder %s678_s7, %s541_s6  ;;  %p545_p2 = scmp.lt.u32.totalorder %s541_s6, %s678_s7 }
 0x238   :  { %p547_p3 = pnand %p545_p2, %p542_p1 }
 0x23a   :  { %550 = shalt.err (!%p547_p3)
}
 0x23b   :  { %354 = dma.vmem_to_hbm [thread:$0]  %s352_s20, 128, %s678_s7, [#allocation5]  }
 0x23c   :  { %555 = dma.done.wait [#allocation5], 128  }
 0x23d   :  { %556 = vsyncadd [#allocation5], 4294967168 }
 0x23e   :  { %358 = vsyncpa [#allocation4], 1 }
 0x23f   :  { %359 = vsyncpa [#allocation7], 1 }
 0x240   :  { %360 = vsyncpa [#allocation5], 1 }

</bundles_post_ra>
